<compile_context>
chip_gen: v7x
topology: tpu7x:2x2x1
jax: 0.10.0
libtpu: 0.0.40
codegen_flags: <defaults>
</compile_context>

<pallas_src>
import jax
import jax.numpy as jnp
from jax import lax
from jax.experimental import pallas as pl
from jax.experimental.pallas import tpu as pltpu

EPS = 1e-5   # PyTorch BatchNorm1d default eps
LANE = 128   # TPU lane width


# --------------------------------------------------------------------------- #
# Kernel
# --------------------------------------------------------------------------- #
def _residual_block_kernel(x_ref, wt_ref, gamma_ref, beta_ref, o_ref):
    # x_ref:     (B, Dp)  full input, resident across all feature tiles
    #                     (matmul LHS + residual source)
    # wt_ref:    (Dp, TN) Linear weight tile, pre-transposed (in, out) layout
    # gamma_ref: (1, Dp)  BatchNorm weight, resident
    # beta_ref:  (1, Dp)  BatchNorm bias,   resident
    # o_ref:     (B, TN)  output tile
    tn = o_ref.shape[1]
    j0 = pl.multiple_of(pl.program_id(0) * tn, tn)   # lane-aligned tile start

    x = x_ref[...]

    # Linear (bias omitted: exactly cancelled by the batch-mean subtraction of
    # training-mode BatchNorm below).  (in, out) weight layout -> plain x @ w
    # on the MXU with f32 accumulation, no per-tile transpose.
    y = jnp.dot(x, wt_ref[...], preferred_element_type=jnp.float32)  # (B, TN)

    # BatchNorm1d, training mode: per-feature batch mean / biased variance.
    mean = jnp.mean(y, axis=0, keepdims=True)                    # (1, TN)
    centered = y - mean
    var = jnp.mean(centered * centered, axis=0, keepdims=True)   # biased var
    y_hat = centered * lax.rsqrt(var + EPS)

    # Affine + ReLU + residual (residual tile sliced from the resident x).
    bn = y_hat * gamma_ref[:, pl.ds(j0, tn)] + beta_ref[:, pl.ds(j0, tn)]
    o_ref[...] = x_ref[:, pl.ds(j0, tn)] + jnp.maximum(bn, 0.0)


# --------------------------------------------------------------------------- #
# VMEM budgeting / tile selection (generation-aware, no 64 MiB clamp)
# --------------------------------------------------------------------------- #
def _vmem_budget_bytes():
    try:
        cap = int(pltpu.get_tpu_info().vmem_capacity_bytes)
    except Exception:
        cap = 64 << 20   # conservative fallback: v7x per-TensorCore VMEM
    return (cap * 7) // 8


def _estimate_vmem(B, Dp, TN, wbytes, x_bufs):
    it = 4  # float32 activations
    est = (x_bufs * B * Dp * it       # resident x
           + 2 * Dp * TN * wbytes     # weight tile (double-buffered)
           + 2 * B * TN * it          # output tile (double-buffered)
           + 2 * 2 * Dp * it)         # gamma + beta (resident, cushion x2)
    return est + (4 << 20)            # headroom for compiler temporaries


def _choose_tn(B, Dp, wbytes, budget):
    for tn in (512, 256, 128):
        if Dp % tn == 0 and _estimate_vmem(B, Dp, tn, wbytes, x_bufs=1) <= budget:
            return tn
    # TODO(synk): two-pass batch-tiled BN fallback when even TN=128 overflows
    #             the per-core VMEM budget (very large B*Dp, v7x first).
    return 128


# --------------------------------------------------------------------------- #
# pallas_call builder
# --------------------------------------------------------------------------- #
def _pallas_forward(x_p, wt_p, g2, be2, *, TN, vmem_limit, single_buffer_resident):
    B, Dp = x_p.shape

    if single_buffer_resident:
        def resident(shape):
            return pl.BlockSpec(shape, lambda j: (0, 0),
                                pipeline_mode=pl.Buffered(1))
    else:
        def resident(shape):
            return pl.BlockSpec(shape, lambda j: (0, 0))

    return pl.pallas_call(
        _residual_block_kernel,
        out_shape=jax.ShapeDtypeStruct((B, Dp), jnp.float32),
        grid_spec=pltpu.PrefetchScalarGridSpec(
            num_scalar_prefetch=0,
            grid=(Dp // TN,),
            in_specs=[
                resident((B, Dp)),                          # x: resident
                pl.BlockSpec((Dp, TN), lambda j: (0, j)),   # weight tile (pipelined)
                resident((1, Dp)),                          # gamma: resident
                resident((1, Dp)),                          # beta:  resident
            ],
            out_specs=pl.BlockSpec((B, TN), lambda j: (0, j)),
        ),
        compiler_params=pltpu.CompilerParams(
            dimension_semantics=("parallel",),   # TODO(synk): verify 2-TC split on v7x
            vmem_limit_bytes=vmem_limit,
        ),
    )(x_p, wt_p, g2, be2)


# --------------------------------------------------------------------------- #
# Public API
# --------------------------------------------------------------------------- #
def prepare_params(w, b, gamma, beta):
    """One-time parameter transform (do NOT call per forward step).

    w: (D, D) PyTorch Linear weight (out, in); b/gamma/beta: (D,).
    `b` is accepted for API parity with nn.Linear but intentionally unused:
    training-mode BatchNorm's mean subtraction cancels it exactly.
    Returns padded, (in, out)-transposed parameters ready for the kernel.
    """
    del b  # mathematically cancelled by BatchNorm centering (training mode)
    D = w.shape[0]
    Dp = pl.cdiv(D, LANE) * LANE
    pad = Dp - D
    wt = w.T  # (in, out) layout -> no per-tile transpose inside the kernel
    if pad:
        wt = jnp.pad(wt, ((0, pad), (0, pad)))
        gamma = jnp.pad(gamma, (0, pad))
        beta = jnp.pad(beta, (0, pad))
    return {
        "wt": wt,
        "gamma": gamma.reshape(1, Dp),
        "beta": beta.reshape(1, Dp),
        "dim": D,
        "dim_padded": Dp,
    }


def residual_block_apply(x, params):
    """Forward pass with pre-prepared parameters (the hot-path entry point)."""
    B, D = x.shape
    Dp = params["dim_padded"]
    assert params["dim"] == D, "parameter dim does not match input feature dim"

    x_p = jnp.pad(x, ((0, 0), (0, Dp - D))) if Dp != D else x
    wt, g2, be2 = params["wt"], params["gamma"], params["beta"]

    budget = _vmem_budget_bytes()
    wbytes = jnp.dtype(wt.dtype).itemsize
    TN = _choose_tn(B, Dp, wbytes, budget)
    # Cushion with x_bufs=2 so the limit also covers the double-buffer fallback.
    est = _estimate_vmem(B, Dp, TN, wbytes, x_bufs=2)
    vmem_limit = int(min(max(est, 32 << 20), budget))

    try:
        out = _pallas_forward(x_p, wt, g2, be2, TN=TN, vmem_limit=vmem_limit,
                              single_buffer_resident=True)
    except Exception:
        # Fallback if this jax version rejects pipeline_mode=pl.Buffered(1)
        # on a pallas_call BlockSpec: default double-buffering (correct, just
        # uses 2x VMEM for the resident operands).
        out = _pallas_forward(x_p, wt, g2, be2, TN=TN, vmem_limit=vmem_limit,
                              single_buffer_resident=False)

    return out[:, :D] if Dp != D else out


def residual_block(x, w, b, gamma, beta):
    """Convenience wrapper: prepare params and apply (use prepare_params +
    residual_block_apply when calling repeatedly)."""
    return residual_block_apply(x, prepare_params(w, b, gamma, beta))


# --------------------------------------------------------------------------- #
# Reference + self-test
# --------------------------------------------------------------------------- #
def _reference(x, w, b, gamma, beta):
    """Pure-JAX reference (PyTorch training-mode semantics, bias included)."""
    y = jnp.dot(x, w.T, precision=lax.Precision.HIGHEST) + b
    mean = jnp.mean(y, axis=0, keepdims=True)
    var = jnp.mean((y - mean) ** 2, axis=0, keepdims=True)
    y_hat = (y - mean) / jnp.sqrt(var + EPS)
    return x + jnp.maximum(y_hat * gamma + beta, 0.0)


def _run_case(key, B, D):
    kx, kw, kb, kg, kbe = jax.random.split(key, 5)
    x = jax.random.normal(kx, (B, D), dtype=jnp.float32)
    bound = 1.0 / float(D) ** 0.5
    w = jax.random.uniform(kw, (D, D), minval=-bound, maxval=bound, dtype=jnp.float32)
    b = jax.random.uniform(kb, (D,), minval=-bound, maxval=bound, dtype=jnp.float32)
    gamma = 1.0 + 0.1 * jax.random.normal(kg, (D,), dtype=jnp.float32)
    beta = 0.1 * jax.random.normal(kbe, (D,), dtype=jnp.float32)

    params = prepare_params(w, b, gamma, beta)          # one-time prep
    out = jax.block_until_ready(residual_block_apply(x, params))
    ref = _reference(x, w, b, gamma, beta)
    assert out.shape == (B, D)
    err = jnp.max(jnp.abs(out - ref))
    assert jnp.allclose(out, ref, atol=1e-4, rtol=1e-4), (
        f"mismatch vs reference for B={B}, D={D}: max abs err {err}")


if __name__ == "__main__":
    key = jax.random.PRNGKey(0)
    k1, k2, k3 = jax.random.split(key, 3)
    _run_case(k1, B=8, D=32)    # lane-padding path (Dp=128, single feature tile)
    _run_case(k2, B=16, D=512)  # large tile path (TN up to 512 on big-VMEM chips)
    _run_case(k3, B=4, D=384)   # multi-tile grid (TN=128, 3 steps) + dynamic residual slice
    print("KERNEL_OK")
</pallas_src>

<mosaic_0001>
module attributes {stable_mosaic.version = 11 : i64} {
  func.func @_residual_block_kernel(%arg0: i32, %arg1: memref<8x128xf32, #tpu.memory_space<vmem>>, %arg2: memref<128x128xf32, #tpu.memory_space<vmem>>, %arg3: memref<1x128xf32, #tpu.memory_space<vmem>>, %arg4: memref<1x128xf32, #tpu.memory_space<vmem>>, %arg5: memref<8x128xf32, #tpu.memory_space<vmem>>) attributes {dimension_semantics = [#tpu.dimension_semantics<parallel>], iteration_bounds = array<i64: 1>, scalar_prefetch = 0 : i64, scratch_operands = 0 : i64, tpu.core_type = #tpu.core_type<tc>, window_params = [{pipeline_mode = #tpu.pipeline_mode<synchronous>, transform_indices = @transform_0, window_bounds = array<i64: 8, 128>}, {transform_indices = @transform_1, window_bounds = array<i64: 128, 128>}, {pipeline_mode = #tpu.pipeline_mode<synchronous>, transform_indices = @transform_2, window_bounds = array<i64: 1, 128>}, {pipeline_mode = #tpu.pipeline_mode<synchronous>, transform_indices = @transform_3, window_bounds = array<i64: 1, 128>}, {transform_indices = @transform_4, window_bounds = array<i64: 8, 128>}]} {
    %c128_i32 = arith.constant 128 : i32
    %0 = arith.muli %arg0, %c128_i32 : i32
    %1 = tpu.assume_multiple %0, 128 : i32
    %c0 = arith.constant 0 : index
    %c0_0 = arith.constant 0 : index
    %2 = vector.load %arg1[%c0, %c0_0] : memref<8x128xf32, #tpu.memory_space<vmem>>, vector<8x128xf32>
    %c0_1 = arith.constant 0 : index
    %c0_2 = arith.constant 0 : index
    %3 = vector.load %arg2[%c0_1, %c0_2] : memref<128x128xf32, #tpu.memory_space<vmem>>, vector<128x128xf32>
    %cst = arith.constant dense<0.000000e+00> : vector<8x128xf32>
    %4 = tpu.matmul %2, %3, %cst {dimension_numbers = #tpu.dot_dimension_numbers<[1], [0], [0], [1], [0, 0, 1, 1], [], []>} : vector<8x128xf32>, vector<128x128xf32>, vector<8x128xf32> -> vector<8x128xf32>
    %cst_3 = arith.constant dense<0.000000e+00> : vector<128xf32>
    %5 = vector.multi_reduction <add>, %4, %cst_3 [0] : vector<8x128xf32> to vector<128xf32>
    %6 = vector.shape_cast %5 : vector<128xf32> to vector<1x128xf32>
    %cst_4 = arith.constant 8.000000e+00 : f32
    %7 = vector.broadcast %cst_4 : f32 to vector<1x128xf32>
    %8 = arith.divf %6, %7 : vector<1x128xf32>
    %9 = vector.broadcast %8 : vector<1x128xf32> to vector<8x128xf32>
    %10 = arith.subf %4, %9 : vector<8x128xf32>
    %11 = arith.mulf %10, %10 : vector<8x128xf32>
    %cst_5 = arith.constant dense<0.000000e+00> : vector<128xf32>
    %12 = vector.multi_reduction <add>, %11, %cst_5 [0] : vector<8x128xf32> to vector<128xf32>
    %13 = vector.shape_cast %12 : vector<128xf32> to vector<1x128xf32>
    %cst_6 = arith.constant 8.000000e+00 : f32
    %14 = vector.broadcast %cst_6 : f32 to vector<1x128xf32>
    %15 = arith.divf %13, %14 : vector<1x128xf32>
    %cst_7 = arith.constant 9.99999974E-6 : f32
    %16 = vector.broadcast %cst_7 : f32 to vector<1x128xf32>
    %17 = arith.addf %15, %16 : vector<1x128xf32>
    %18 = math.rsqrt %17 : vector<1x128xf32>
    %19 = vector.broadcast %18 : vector<1x128xf32> to vector<8x128xf32>
    %20 = arith.mulf %10, %19 : vector<8x128xf32>
    %c0_8 = arith.constant 0 : index
    %21 = arith.index_cast %1 : i32 to index
    %22 = vector.load %arg3[%c0_8, %21] : memref<1x128xf32, #tpu.memory_space<vmem>>, vector<1x128xf32>
    %23 = vector.broadcast %22 : vector<1x128xf32> to vector<8x128xf32>
    %24 = arith.mulf %20, %23 : vector<8x128xf32>
    %c0_9 = arith.constant 0 : index
    %25 = arith.index_cast %1 : i32 to index
    %26 = vector.load %arg4[%c0_9, %25] : memref<1x128xf32, #tpu.memory_space<vmem>>, vector<1x128xf32>
    %27 = vector.broadcast %26 : vector<1x128xf32> to vector<8x128xf32>
    %28 = arith.addf %24, %27 : vector<8x128xf32>
    %c0_10 = arith.constant 0 : index
    %29 = arith.index_cast %1 : i32 to index
    %30 = vector.load %arg1[%c0_10, %29] : memref<8x128xf32, #tpu.memory_space<vmem>>, vector<8x128xf32>
    %cst_11 = arith.constant 0.000000e+00 : f32
    %31 = vector.broadcast %cst_11 : f32 to vector<8x128xf32>
    %32 = arith.maximumf %28, %31 : vector<8x128xf32>
    %33 = arith.addf %30, %32 : vector<8x128xf32>
    %c0_12 = arith.constant 0 : index
    %c0_13 = arith.constant 0 : index
    %34 = vector.load %arg5[%c0_12, %c0_13] : memref<8x128xf32, #tpu.memory_space<vmem>>, vector<8x128xf32>
    tpu.vector_store %arg5[%c0_12, %c0_13], %33 {strides = array<i32>} : memref<8x128xf32, #tpu.memory_space<vmem>>, vector<8x128xf32>,
    return
  }
  func.func @transform_0(%arg0: i32) -> (i32, i32) {
    %c0_i32 = arith.constant 0 : i32
    %c0_i32_0 = arith.constant 0 : i32
    %c0_i32_1 = arith.constant 0 : i32
    return %c0_i32, %c0_i32_0 : i32, i32
  }
  func.func @transform_1(%arg0: i32) -> (i32, i32) {
    %c0_i32 = arith.constant 0 : i32
    %c0_i32_0 = arith.constant 0 : i32
    return %c0_i32, %arg0 : i32, i32
  }
  func.func @transform_2(%arg0: i32) -> (i32, i32) {
    %c0_i32 = arith.constant 0 : i32
    %c0_i32_0 = arith.constant 0 : i32
    %c0_i32_1 = arith.constant 0 : i32
    return %c0_i32, %c0_i32_0 : i32, i32
  }
  func.func @transform_3(%arg0: i32) -> (i32, i32) {
    %c0_i32 = arith.constant 0 : i32
    %c0_i32_0 = arith.constant 0 : i32
    %c0_i32_1 = arith.constant 0 : i32
    return %c0_i32, %c0_i32_0 : i32, i32
  }
  func.func @transform_4(%arg0: i32) -> (i32, i32) {
    %c0_i32 = arith.constant 0 : i32
    %c0_i32_0 = arith.constant 0 : i32
    return %c0_i32, %arg0 : i32, i32
  }
}

module attributes {stable_mosaic.version = 11 : i64} {
  func.func @_residual_block_kernel(%arg0: i32, %arg1: memref<8x128xf32, #tpu.memory_space<vmem>>, %arg2: memref<128x128xf32, #tpu.memory_space<vmem>>, %arg3: memref<1x128xf32, #tpu.memory_space<vmem>>, %arg4: memref<1x128xf32, #tpu.memory_space<vmem>>, %arg5: memref<8x128xf32, #tpu.memory_space<vmem>>) attributes {dimension_semantics = [#tpu.dimension_semantics<parallel>], iteration_bounds = array<i64: 1>, scalar_prefetch = 0 : i64, scratch_operands = 0 : i64, tpu.core_type = #tpu.core_type<tc>, window_params = [{pipeline_mode = #tpu.pipeline_mode<synchronous>, transform_indices = @transform_0, window_bounds = array<i64: 8, 128>}, {transform_indices = @transform_1, window_bounds = array<i64: 128, 128>}, {pipeline_mode = #tpu.pipeline_mode<synchronous>, transform_indices = @transform_2, window_bounds = array<i64: 1, 128>}, {pipeline_mode = #tpu.pipeline_mode<synchronous>, transform_indices = @transform_3, window_bounds = array<i64: 1, 128>}, {transform_indices = @transform_4, window_bounds = array<i64: 8, 128>}]} {
    %c128_i32 = arith.constant 128 : i32
    %0 = arith.muli %arg0, %c128_i32 : i32
    %1 = tpu.assume_multiple %0, 128 : i32
    %c0 = arith.constant 0 : index
    %c0_0 = arith.constant 0 : index
    %2 = vector.load %arg1[%c0, %c0_0] : memref<8x128xf32, #tpu.memory_space<vmem>>, vector<8x128xf32>
    %c0_1 = arith.constant 0 : index
    %c0_2 = arith.constant 0 : index
    %3 = vector.load %arg2[%c0_1, %c0_2] : memref<128x128xf32, #tpu.memory_space<vmem>>, vector<128x128xf32>
    %cst = arith.constant dense<0.000000e+00> : vector<8x128xf32>
    %4 = tpu.matmul %2, %3, %cst {dimension_numbers = #tpu.dot_dimension_numbers<[1], [0], [0], [1], [0, 0, 1, 1], [], []>} : vector<8x128xf32>, vector<128x128xf32>, vector<8x128xf32> -> vector<8x128xf32>
    %cst_3 = arith.constant dense<0.000000e+00> : vector<128xf32>
    %5 = vector.multi_reduction <add>, %4, %cst_3 [0] : vector<8x128xf32> to vector<128xf32>
    %6 = vector.shape_cast %5 : vector<128xf32> to vector<1x128xf32>
    %cst_4 = arith.constant 8.000000e+00 : f32
    %7 = vector.broadcast %cst_4 : f32 to vector<1x128xf32>
    %8 = arith.divf %6, %7 : vector<1x128xf32>
    %9 = vector.broadcast %8 : vector<1x128xf32> to vector<8x128xf32>
    %10 = arith.subf %4, %9 : vector<8x128xf32>
    %11 = arith.mulf %10, %10 : vector<8x128xf32>
    %cst_5 = arith.constant dense<0.000000e+00> : vector<128xf32>
    %12 = vector.multi_reduction <add>, %11, %cst_5 [0] : vector<8x128xf32> to vector<128xf32>
    %13 = vector.shape_cast %12 : vector<128xf32> to vector<1x128xf32>
    %cst_6 = arith.constant 8.000000e+00 : f32
    %14 = vector.broadcast %cst_6 : f32 to vector<1x128xf32>
    %15 = arith.divf %13, %14 : vector<1x128xf32>
    %cst_7 = arith.constant 9.99999974E-6 : f32
    %16 = vector.broadcast %cst_7 : f32 to vector<1x128xf32>
    %17 = arith.addf %15, %16 : vector<1x128xf32>
    %18 = math.rsqrt %17 : vector<1x128xf32>
    %19 = vector.broadcast %18 : vector<1x128xf32> to vector<8x128xf32>
    %20 = arith.mulf %10, %19 : vector<8x128xf32>
    %c0_8 = arith.constant 0 : index
    %21 = arith.index_cast %1 : i32 to index
    %22 = vector.load %arg3[%c0_8, %21] : memref<1x128xf32, #tpu.memory_space<vmem>>, vector<1x128xf32>
    %23 = vector.broadcast %22 : vector<1x128xf32> to vector<8x128xf32>
    %24 = arith.mulf %20, %23 : vector<8x128xf32>
    %c0_9 = arith.constant 0 : index
    %25 = arith.index_cast %1 : i32 to index
    %26 = vector.load %arg4[%c0_9, %25] : memref<1x128xf32, #tpu.memory_space<vmem>>, vector<1x128xf32>
    %27 = vector.broadcast %26 : vector<1x128xf32> to vector<8x128xf32>
    %28 = arith.addf %24, %27 : vector<8x128xf32>
    %c0_10 = arith.constant 0 : index
    %29 = arith.index_cast %1 : i32 to index
    %30 = vector.load %arg1[%c0_10, %29] : memref<8x128xf32, #tpu.memory_space<vmem>>, vector<8x128xf32>
    %cst_11 = arith.constant 0.000000e+00 : f32
    %31 = vector.broadcast %cst_11 : f32 to vector<8x128xf32>
    %32 = arith.maximumf %28, %31 : vector<8x128xf32>
    %33 = arith.addf %30, %32 : vector<8x128xf32>
    %c0_12 = arith.constant 0 : index
    %c0_13 = arith.constant 0 : index
    %34 = vector.load %arg5[%c0_12, %c0_13] : memref<8x128xf32, #tpu.memory_space<vmem>>, vector<8x128xf32>
    tpu.vector_store %arg5[%c0_12, %c0_13], %33 {strides = array<i32>} : memref<8x128xf32, #tpu.memory_space<vmem>>, vector<8x128xf32>,
    return
  }
  func.func @transform_0(%arg0: i32) -> (i32, i32) {
    %c0_i32 = arith.constant 0 : i32
    %c0_i32_0 = arith.constant 0 : i32
    %c0_i32_1 = arith.constant 0 : i32
    return %c0_i32, %c0_i32_0 : i32, i32
  }
  func.func @transform_1(%arg0: i32) -> (i32, i32) {
    %c0_i32 = arith.constant 0 : i32
    %c0_i32_0 = arith.constant 0 : i32
    return %c0_i32, %arg0 : i32, i32
  }
  func.func @transform_2(%arg0: i32) -> (i32, i32) {
    %c0_i32 = arith.constant 0 : i32
    %c0_i32_0 = arith.constant 0 : i32
    %c0_i32_1 = arith.constant 0 : i32
    return %c0_i32, %c0_i32_0 : i32, i32
  }
  func.func @transform_3(%arg0: i32) -> (i32, i32) {
    %c0_i32 = arith.constant 0 : i32
    %c0_i32_0 = arith.constant 0 : i32
    %c0_i32_1 = arith.constant 0 : i32
    return %c0_i32, %c0_i32_0 : i32, i32
  }
  func.func @transform_4(%arg0: i32) -> (i32, i32) {
    %c0_i32 = arith.constant 0 : i32
    %c0_i32_0 = arith.constant 0 : i32
    return %c0_i32, %arg0 : i32, i32
  }
}

</mosaic_0001>

<bundles_post_ra>
// kernel: tpu_custom_call.1
= control target key start
LH: loop header
LB: loop body
LE: loop exit
PB: predicated region body
PF: predicated region fallthrough
CT: control target
= control target key end

     0   :  { %9 = vsyncpa [#allocation3], 0  ;;  %s438_s0 = inlined_call_operand.hbm [shape: f32[8,128], index: 0, kind: input, shape index: {}]   ;;  %s439_s1 = inlined_call_operand.hbm [shape: f32[128,128], index: 1, kind: input, shape index: {}]   ;;  %s440_s2 = inlined_call_operand.vmem [shape: f32[1,128], index: 2, kind: input, shape index: {}]   ;;  %s441_s3 = inlined_call_operand.vmem [shape: f32[1,128], index: 3, kind: input, shape index: {}]   ;;  %s442_s4 = inlined_call_operand.hbm [shape: f32[8,128], index: 4, kind: output, shape index: {}]  }
   0x1   :  { %10 = vsyncpa [#allocation6], 0 }
   0x2   :  { %11 = vsyncpa [#allocation4], 0  ;;  %s356_s15 = smov [#allocation2]   ;;  %s357_s17 = smov [#allocation5]  }
   0x3   :  { %s18_s16 = sshll.u32 %s356_s15, 4  ;;  %s27_s18 = sshll.u32 %s357_s17, 4  ;;  %s19_s16 = int_to_ptr.vmem [resolvable:$true] %s18_s16  ;;  %s389_s18 = int_to_ptr.vmem [resolvable:$true] %s27_s18 }
   0x4   :  { %s284_s21 = scalar_lea.hbm %s438_s0, 128 }
   0x5   :  { %p285_p0 = scmp.ne.s32.totalorder %s438_s0, %s284_s21  ;;  %p288_p1 = scmp.lt.u32.totalorder %s284_s21, %s438_s0 }
   0x7   :  { %p290_p2 = pnand %p288_p1, %p285_p0 }
   0x9   :  { %293 = shalt.err (!%p290_p2)
}
   0xa   :  { %s294_s26 = scalar_lea.vmem %s19_s16, 128  ;;  %p299_p4 = scmp.lt.s32.totalorder %s19_s16, %s19_s16 }
   0xb   :  { %p295_p3 = scmp.ne.s32.totalorder %s19_s16, %s294_s26  ;;  %p300_p5 = scmp.lt.s32.totalorder %s294_s26, %s294_s26 }
   0xd   :  { %p301_p6 = por %p300_p5, %p299_p4 }
   0xf   :  { %p302_p7 = pnand %p301_p6, %p295_p3 }
  0x11   :  { %305 = shalt.err (!%p302_p7)
}
  0x12   :  { %21 = dma.hbm_to_vmem [thread:$0]  %s438_s0, 128, %s19_s16, [#allocation3]  }
  0x13   :  { %s306_s5 = scalar_lea.hbm %s439_s1, 2048 }
  0x14   :  { %p307_p8 = scmp.ne.s32.totalorder %s439_s1, %s306_s5  ;;  %p310_p9 = scmp.lt.u32.totalorder %s306_s5, %s439_s1 }
  0x16   :  { %p312_p10 = pnand %p310_p9, %p307_p8 }
  0x18   :  { %315 = shalt.err (!%p312_p10)
}
  0x19   :  { %s316_s10 = scalar_lea.vmem %s389_s18, 2048  ;;  %p321_p12 = scmp.lt.s32.totalorder %s389_s18, %s389_s18 }
  0x1a   :  { %p317_p11 = scmp.ne.s32.totalorder %s389_s18, %s316_s10  ;;  %p322_p13 = scmp.lt.s32.totalorder %s316_s10, %s316_s10 }
  0x1c   :  { %p323_p0 = por %p322_p13, %p321_p12 }
  0x1e   :  { %p324_p1 = pnand %p323_p0, %p317_p11 }
  0x20   :  { %327 = shalt.err (!%p324_p1)
}
  0x21   :  { %s358_s0 = smov 128   ;;  %s359_s11 = smov 8  }
  0x22   :  { %33 = dma.hbm_to_vmem [thread:$0]  %s439_s1, 2048, %s389_s18, [#allocation6], %s358_s0, %s358_s0, %s359_s11  }
  0x23   :  { %350 = dma.done.wait [#allocation3], 128  }
  0x24   :  { %351 = vsyncadd [#allocation3], 4294967168 }
  0x25   :  { %352 = dma.done.wait [#allocation6], 2048  }
  0x26   :  { %353 = vsyncadd [#allocation6], 4294965248  ;;  %v360_v0 = vmov 0.0|0.0   ;;  %vm361_vm0 = vmmov 0   ;;  %v362_v1 = vmov 0.0   ;;  %v46_v2 = vld [vmem:[#allocation5] sm:$0xff] }
  0x27   :  { %250 = vmatprep.subr.bf16.mxu0 %v360_v0  ;;  %247 = vmatprep.mubr.msk.f32.mxu0 %vm361_vm0, %v362_v1  ;;  %v47_v3 = vld [vmem:[#allocation5 + $0x8] sm:$0xff]  ;;  %v48_v4 = vld [vmem:[#allocation5 + $0x10] sm:$0xff]  ;;  %v49_v6 = vld [vmem:[#allocation5 + $0x18] sm:$0xff]  ;;  %s363_s17 = smov [#allocation7]  }
  0x28   :  { %v251_v5 = vpack.c.bf16 %v47_v3, %v46_v2  ;;  %v254_v7 = vpack.c.bf16 %v49_v6, %v48_v4  ;;  %v50_v8 = vld [vmem:[#allocation5 + $0x20] sm:$0xff]  ;;  %v51_v9 = vld [vmem:[#allocation5 + $0x28] sm:$0xff]  ;;  %v52_v11 = vld [vmem:[#allocation5 + $0x30] sm:$0xff]  ;;  %s183_s18 = sshll.u32 %s363_s17, 4  ;;  %s184_s18 = int_to_ptr.vmem [resolvable:$true] %s183_s18 }
  0x29   :  { %v257_v10 = vpack.c.bf16 %v51_v9, %v50_v8  ;;  %v53_v12 = vld [vmem:[#allocation5 + $0x38] sm:$0xff]  ;;  %v54_v14 = vld [vmem:[#allocation5 + $0x40] sm:$0xff]  ;;  %v55_v15 = vld [vmem:[#allocation5 + $0x48] sm:$0xff]  ;;  %s328_s19 = scalar_lea.vmem %s184_s18, 128  ;;  %p333_p3 = scmp.lt.s32.totalorder %s184_s18, %s184_s18 }
  0x2a   :  { %252 = vmatpush3.bf16.msra.mxu0 %v251_v5  ;;  %v260_v13 = vpack.c.bf16 %v53_v12, %v52_v11  ;;  %v263_v16 = vpack.c.bf16 %v55_v15, %v54_v14  ;;  %v56_v17 = vld [vmem:[#allocation5 + $0x50] sm:$0xff]  ;;  %v57_v18 = vld [vmem:[#allocation5 + $0x58] sm:$0xff]  ;;  %v58_v20 = vld [vmem:[#allocation5 + $0x60] sm:$0xff]  ;;  %p329_p2 = scmp.ne.s32.totalorder %s184_s18, %s328_s19  ;;  %p334_p4 = scmp.lt.s32.totalorder %s328_s19, %s328_s19 }
  0x2b   :  { %253 = vmatprep.subr.bf16.mxu0 %v360_v0  ;;  %v266_v19 = vpack.c.bf16 %v57_v18, %v56_v17  ;;  %v59_v21 = vld [vmem:[#allocation5 + $0x68] sm:$0xff]  ;;  %v60_v23 = vld [vmem:[#allocation5 + $0x70] sm:$0xff]  ;;  %v61_v24 = vld [vmem:[#allocation5 + $0x78] sm:$0xff] }
  0x2c   :  { %v269_v22 = vpack.c.bf16 %v59_v21, %v58_v20  ;;  %v272_v25 = vpack.c.bf16 %v61_v24, %v60_v23  ;;  %v45_v26 = vld [vmem:[#allocation2] sm:$0xff]  ;;  %p335_p5 = por %p334_p4, %p333_p3 }
  0x2d   :  { %v196_v47 = vld [vmem:[%s440_s2] ss:$0 sm:$0xff] }
  0x2e   :  { %255 = vmatpush3.bf16.msra.mxu0 %v254_v7  ;;  %v197_v49 = vld [vmem:[%s441_s3] ss:$0 sm:$0xff]  ;;  %p336_p6 = pnand %p335_p5, %p329_p2 }
  0x2f   :  { %256 = vmatprep.subr.bf16.mxu0 %v360_v0 }
  0x32   :  { %258 = vmatpush3.bf16.msra.mxu0 %v257_v10 }
  0x33   :  { %259 = vmatprep.subr.bf16.mxu0 %v360_v0 }
  0x36   :  { %261 = vmatpush3.bf16.msra.mxu0 %v260_v13 }
  0x37   :  { %262 = vmatprep.subr.bf16.mxu0 %v360_v0 }
  0x3a   :  { %264 = vmatpush3.bf16.msra.mxu0 %v263_v16 }
  0x3b   :  { %265 = vmatprep.subr.bf16.mxu0 %v360_v0 }
  0x3e   :  { %267 = vmatpush3.bf16.msra.mxu0 %v266_v19 }
  0x3f   :  { %268 = vmatprep.subr.bf16.mxu0 %v360_v0 }
  0x42   :  { %270 = vmatpush3.bf16.msra.mxu0 %v269_v22 }
  0x43   :  { %271 = vmatprep.subr.bf16.mxu0 %v360_v0 }
  0x46   :  { %273 = vmatpush3.bf16.msra.mxu0 %v272_v25 }
  0x49   :  { %248 = vmatmul.mubr.f32.vlgmr.msra.gmra.mrb[0].mxu0 %v45_v26 }
 0x11c   :  { %v128_v27 = vpop.f32.mrb[0].mxu0 }
 0x11d   :  { %v132_v28 = vrot.slane %v128_v27, 4  ;;  %v249_v29 = vpop.f32.mrb[1].mxu0 }
 0x11f   :  { %v133_v30 = vadd.f32 %v132_v28, %v128_v27 }
 0x121   :  { %v134_v31 = vrot.slane %v133_v30, 2 }
 0x123   :  { %v135_v32 = vadd.f32 %v134_v31, %v133_v30 }
 0x125   :  { %v136_v33 = vrot.slane %v135_v32, 1 }
 0x127   :  { %v137_v34 = vadd.f32 %v136_v33, %v135_v32 }
 0x129   :  { %v139_v35 = vmul.f32 0.125, %v137_v34 }
 0x12b   :  { %v140_v36 = vsub.f32 %v128_v27, %v139_v35 }
 0x12d   :  { %v141_v37 = vmul.f32 %v140_v36, %v140_v36 }
 0x12f   :  { %v142_v38 = vrot.slane %v141_v37, 4 }
 0x131   :  { %v143_v39 = vadd.f32 %v142_v38, %v141_v37 }
 0x133   :  { %v144_v40 = vrot.slane %v143_v39, 2 }
 0x135   :  { %v145_v41 = vadd.f32 %v144_v40, %v143_v39 }
 0x137   :  { %v146_v42 = vrot.slane %v145_v41, 1 }
 0x139   :  { %v147_v43 = vadd.f32 %v146_v42, %v145_v41 }
 0x13b   :  { %v148_v44 = vmul.f32 0.125, %v147_v43 }
 0x13d   :  { %v149_v45 = vadd.f32 1e-05, %v148_v44 }
 0x13f   :  { %282 = vrsqrt.f32 %v149_v45 }
 0x149   :  { %v283_v46 = vpop.eup %282 }
 0x14a   :  { %v151_v48 = vmul.f32 %v283_v46, %v140_v36 }
 0x14c   :  { %v162_v50 = vmul.f32 %v196_v47, %v151_v48 }
 0x14e   :  { %v171_v51 = vadd.f32 %v197_v49, %v162_v50 }
 0x150   :  { %v174_v52 = vmax.f32 %v171_v51, 0.0 }
 0x152   :  { %v175_v53 = vadd.f32 %v174_v52, %v45_v26 }
 0x154   :  { %176 = vst [vmem:[#allocation7] sm:$0xff] %v175_v53 }
 0x155   :  { %339 = shalt.err (!%p336_p6)
}
 0x156   :  { %s340_s21 = scalar_lea.hbm %s442_s4, 128 }
 0x157   :  { %p341_p7 = scmp.ne.s32.totalorder %s442_s4, %s340_s21  ;;  %p344_p8 = scmp.lt.u32.totalorder %s340_s21, %s442_s4 }
 0x159   :  { %p346_p9 = pnand %p344_p8, %p341_p7 }
 0x15b   :  { %349 = shalt.err (!%p346_p9)
}
 0x15c   :  { %186 = dma.vmem_to_hbm [thread:$0]  %s184_s18, 128, %s442_s4, [#allocation4]  }
 0x15d   :  { %354 = dma.done.wait [#allocation4], 128  }
 0x15e   :  { %355 = vsyncadd [#allocation4], 4294967168 }
 0x15f   :  { %190 = vsyncpa [#allocation3], 1 }
 0x160   :  { %191 = vsyncpa [#allocation6], 1 }
 0x161   :  { %192 = vsyncpa [#allocation4], 1 }

// kernel: tpu_custom_call.1
= control target key start
LH: loop header
LB: loop body
LE: loop exit
PB: predicated region body
PF: predicated region fallthrough
CT: control target
= control target key end

     0   :  { %9 = vsyncpa [#allocation3], 0  ;;  %s438_s0 = inlined_call_operand.hbm [shape: f32[8,128], index: 0, kind: input, shape index: {}]   ;;  %s439_s1 = inlined_call_operand.hbm [shape: f32[128,128], index: 1, kind: input, shape index: {}]   ;;  %s440_s2 = inlined_call_operand.vmem [shape: f32[1,128], index: 2, kind: input, shape index: {}]   ;;  %s441_s3 = inlined_call_operand.vmem [shape: f32[1,128], index: 3, kind: input, shape index: {}]   ;;  %s442_s4 = inlined_call_operand.hbm [shape: f32[8,128], index: 4, kind: output, shape index: {}]  }
   0x1   :  { %10 = vsyncpa [#allocation6], 0 }
   0x2   :  { %11 = vsyncpa [#allocation4], 0  ;;  %s356_s15 = smov [#allocation2]   ;;  %s357_s17 = smov [#allocation5]  }
   0x3   :  { %s18_s16 = sshll.u32 %s356_s15, 4  ;;  %s27_s18 = sshll.u32 %s357_s17, 4  ;;  %s19_s16 = int_to_ptr.vmem [resolvable:$true] %s18_s16  ;;  %s389_s18 = int_to_ptr.vmem [resolvable:$true] %s27_s18 }
   0x4   :  { %s284_s21 = scalar_lea.hbm %s438_s0, 128 }
   0x5   :  { %p285_p0 = scmp.ne.s32.totalorder %s438_s0, %s284_s21  ;;  %p288_p1 = scmp.lt.u32.totalorder %s284_s21, %s438_s0 }
   0x7   :  { %p290_p2 = pnand %p288_p1, %p285_p0 }
   0x9   :  { %293 = shalt.err (!%p290_p2)
}
   0xa   :  { %s294_s26 = scalar_lea.vmem %s19_s16, 128  ;;  %p299_p4 = scmp.lt.s32.totalorder %s19_s16, %s19_s16 }
   0xb   :  { %p295_p3 = scmp.ne.s32.totalorder %s19_s16, %s294_s26  ;;  %p300_p5 = scmp.lt.s32.totalorder %s294_s26, %s294_s26 }
   0xd   :  { %p301_p6 = por %p300_p5, %p299_p4 }
   0xf   :  { %p302_p7 = pnand %p301_p6, %p295_p3 }
  0x11   :  { %305 = shalt.err (!%p302_p7)
}
  0x12   :  { %21 = dma.hbm_to_vmem [thread:$0]  %s438_s0, 128, %s19_s16, [#allocation3]  }
  0x13   :  { %s306_s5 = scalar_lea.hbm %s439_s1, 2048 }
  0x14   :  { %p307_p8 = scmp.ne.s32.totalorder %s439_s1, %s306_s5  ;;  %p310_p9 = scmp.lt.u32.totalorder %s306_s5, %s439_s1 }
  0x16   :  { %p312_p10 = pnand %p310_p9, %p307_p8 }
  0x18   :  { %315 = shalt.err (!%p312_p10)
}
  0x19   :  { %s316_s10 = scalar_lea.vmem %s389_s18, 2048  ;;  %p321_p12 = scmp.lt.s32.totalorder %s389_s18, %s389_s18 }
  0x1a   :  { %p317_p11 = scmp.ne.s32.totalorder %s389_s18, %s316_s10  ;;  %p322_p13 = scmp.lt.s32.totalorder %s316_s10, %s316_s10 }
  0x1c   :  { %p323_p0 = por %p322_p13, %p321_p12 }
  0x1e   :  { %p324_p1 = pnand %p323_p0, %p317_p11 }
  0x20   :  { %327 = shalt.err (!%p324_p1)
}
  0x21   :  { %s358_s0 = smov 128   ;;  %s359_s11 = smov 8  }
  0x22   :  { %33 = dma.hbm_to_vmem [thread:$0]  %s439_s1, 2048, %s389_s18, [#allocation6], %s358_s0, %s358_s0, %s359_s11  }
  0x23   :  { %350 = dma.done.wait [#allocation3], 128  }
  0x24   :  { %351 = vsyncadd [#allocation3], 4294967168 }
  0x25   :  { %352 = dma.done.wait [#allocation6], 2048  }
  0x26   :  { %353 = vsyncadd [#allocation6], 4294965248  ;;  %v360_v0 = vmov 0.0|0.0   ;;  %vm361_vm0 = vmmov 0   ;;  %v362_v1 = vmov 0.0   ;;  %v46_v2 = vld [vmem:[#allocation5] sm:$0xff] }
  0x27   :  { %250 = vmatprep.subr.bf16.mxu0 %v360_v0  ;;  %247 = vmatprep.mubr.msk.f32.mxu0 %vm361_vm0, %v362_v1  ;;  %v47_v3 = vld [vmem:[#allocation5 + $0x8] sm:$0xff]  ;;  %v48_v4 = vld [vmem:[#allocation5 + $0x10] sm:$0xff]  ;;  %v49_v6 = vld [vmem:[#allocation5 + $0x18] sm:$0xff]  ;;  %s363_s17 = smov [#allocation7]  }
  0x28   :  { %v251_v5 = vpack.c.bf16 %v47_v3, %v46_v2  ;;  %v254_v7 = vpack.c.bf16 %v49_v6, %v48_v4  ;;  %v50_v8 = vld [vmem:[#allocation5 + $0x20] sm:$0xff]  ;;  %v51_v9 = vld [vmem:[#allocation5 + $0x28] sm:$0xff]  ;;  %v52_v11 = vld [vmem:[#allocation5 + $0x30] sm:$0xff]  ;;  %s183_s18 = sshll.u32 %s363_s17, 4  ;;  %s184_s18 = int_to_ptr.vmem [resolvable:$true] %s183_s18 }
  0x29   :  { %v257_v10 = vpack.c.bf16 %v51_v9, %v50_v8  ;;  %v53_v12 = vld [vmem:[#allocation5 + $0x38] sm:$0xff]  ;;  %v54_v14 = vld [vmem:[#allocation5 + $0x40] sm:$0xff]  ;;  %v55_v15 = vld [vmem:[#allocation5 + $0x48] sm:$0xff]  ;;  %s328_s19 = scalar_lea.vmem %s184_s18, 128  ;;  %p333_p3 = scmp.lt.s32.totalorder %s184_s18, %s184_s18 }
  0x2a   :  { %252 = vmatpush3.bf16.msra.mxu0 %v251_v5  ;;  %v260_v13 = vpack.c.bf16 %v53_v12, %v52_v11  ;;  %v263_v16 = vpack.c.bf16 %v55_v15, %v54_v14  ;;  %v56_v17 = vld [vmem:[#allocation5 + $0x50] sm:$0xff]  ;;  %v57_v18 = vld [vmem:[#allocation5 + $0x58] sm:$0xff]  ;;  %v58_v20 = vld [vmem:[#allocation5 + $0x60] sm:$0xff]  ;;  %p329_p2 = scmp.ne.s32.totalorder %s184_s18, %s328_s19  ;;  %p334_p4 = scmp.lt.s32.totalorder %s328_s19, %s328_s19 }
  0x2b   :  { %253 = vmatprep.subr.bf16.mxu0 %v360_v0  ;;  %v266_v19 = vpack.c.bf16 %v57_v18, %v56_v17  ;;  %v59_v21 = vld [vmem:[#allocation5 + $0x68] sm:$0xff]  ;;  %v60_v23 = vld [vmem:[#allocation5 + $0x70] sm:$0xff]  ;;  %v61_v24 = vld [vmem:[#allocation5 + $0x78] sm:$0xff] }
  0x2c   :  { %v269_v22 = vpack.c.bf16 %v59_v21, %v58_v20  ;;  %v272_v25 = vpack.c.bf16 %v61_v24, %v60_v23  ;;  %v45_v26 = vld [vmem:[#allocation2] sm:$0xff]  ;;  %p335_p5 = por %p334_p4, %p333_p3 }
  0x2d   :  { %v196_v47 = vld [vmem:[%s440_s2] ss:$0 sm:$0xff] }
  0x2e   :  { %255 = vmatpush3.bf16.msra.mxu0 %v254_v7  ;;  %v197_v49 = vld [vmem:[%s441_s3] ss:$0 sm:$0xff]  ;;  %p336_p6 = pnand %p335_p5, %p329_p2 }
  0x2f   :  { %256 = vmatprep.subr.bf16.mxu0 %v360_v0 }
  0x32   :  { %258 = vmatpush3.bf16.msra.mxu0 %v257_v10 }
  0x33   :  { %259 = vmatprep.subr.bf16.mxu0 %v360_v0 }
  0x36   :  { %261 = vmatpush3.bf16.msra.mxu0 %v260_v13 }
  0x37   :  { %262 = vmatprep.subr.bf16.mxu0 %v360_v0 }
  0x3a   :  { %264 = vmatpush3.bf16.msra.mxu0 %v263_v16 }
  0x3b   :  { %265 = vmatprep.subr.bf16.mxu0 %v360_v0 }
  0x3e   :  { %267 = vmatpush3.bf16.msra.mxu0 %v266_v19 }
  0x3f   :  { %268 = vmatprep.subr.bf16.mxu0 %v360_v0 }
  0x42   :  { %270 = vmatpush3.bf16.msra.mxu0 %v269_v22 }
  0x43   :  { %271 = vmatprep.subr.bf16.mxu0 %v360_v0 }
  0x46   :  { %273 = vmatpush3.bf16.msra.mxu0 %v272_v25 }
  0x49   :  { %248 = vmatmul.mubr.f32.vlgmr.msra.gmra.mrb[0].mxu0 %v45_v26 }
 0x11c   :  { %v128_v27 = vpop.f32.mrb[0].mxu0 }
 0x11d   :  { %v132_v28 = vrot.slane %v128_v27, 4  ;;  %v249_v29 = vpop.f32.mrb[1].mxu0 }
 0x11f   :  { %v133_v30 = vadd.f32 %v132_v28, %v128_v27 }
 0x121   :  { %v134_v31 = vrot.slane %v133_v30, 2 }
 0x123   :  { %v135_v32 = vadd.f32 %v134_v31, %v133_v30 }
 0x125   :  { %v136_v33 = vrot.slane %v135_v32, 1 }
 0x127   :  { %v137_v34 = vadd.f32 %v136_v33, %v135_v32 }
 0x129   :  { %v139_v35 = vmul.f32 0.125, %v137_v34 }
 0x12b   :  { %v140_v36 = vsub.f32 %v128_v27, %v139_v35 }
 0x12d   :  { %v141_v37 = vmul.f32 %v140_v36, %v140_v36 }
 0x12f   :  { %v142_v38 = vrot.slane %v141_v37, 4 }
 0x131   :  { %v143_v39 = vadd.f32 %v142_v38, %v141_v37 }
 0x133   :  { %v144_v40 = vrot.slane %v143_v39, 2 }
 0x135   :  { %v145_v41 = vadd.f32 %v144_v40, %v143_v39 }
 0x137   :  { %v146_v42 = vrot.slane %v145_v41, 1 }
 0x139   :  { %v147_v43 = vadd.f32 %v146_v42, %v145_v41 }
 0x13b   :  { %v148_v44 = vmul.f32 0.125, %v147_v43 }
 0x13d   :  { %v149_v45 = vadd.f32 1e-05, %v148_v44 }
 0x13f   :  { %282 = vrsqrt.f32 %v149_v45 }
 0x149   :  { %v283_v46 = vpop.eup %282 }
 0x14a   :  { %v151_v48 = vmul.f32 %v283_v46, %v140_v36 }
 0x14c   :  { %v162_v50 = vmul.f32 %v196_v47, %v151_v48 }
 0x14e   :  { %v171_v51 = vadd.f32 %v197_v49, %v162_v50 }
 0x150   :  { %v174_v52 = vmax.f32 %v171_v51, 0.0 }
 0x152   :  { %v175_v53 = vadd.f32 %v174_v52, %v45_v26 }
 0x154   :  { %176 = vst [vmem:[#allocation7] sm:$0xff] %v175_v53 }
 0x155   :  { %339 = shalt.err (!%p336_p6)
}
 0x156   :  { %s340_s21 = scalar_lea.hbm %s442_s4, 128 }
 0x157   :  { %p341_p7 = scmp.ne.s32.totalorder %s442_s4, %s340_s21  ;;  %p344_p8 = scmp.lt.u32.totalorder %s340_s21, %s442_s4 }
 0x159   :  { %p346_p9 = pnand %p344_p8, %p341_p7 }
 0x15b   :  { %349 = shalt.err (!%p346_p9)
}
 0x15c   :  { %186 = dma.vmem_to_hbm [thread:$0]  %s184_s18, 128, %s442_s4, [#allocation4]  }
 0x15d   :  { %354 = dma.done.wait [#allocation4], 128  }
 0x15e   :  { %355 = vsyncadd [#allocation4], 4294967168 }
 0x15f   :  { %190 = vsyncpa [#allocation3], 1 }
 0x160   :  { %191 = vsyncpa [#allocation6], 1 }
 0x161   :  { %192 = vsyncpa [#allocation4], 1 }

</bundles_post_ra>
